<compile_context>
chip_gen: v7x
topology: tpu7x:2x2x1
jax: 0.10.0
libtpu: 0.0.40
codegen_flags: <defaults>
</compile_context>

<pallas_src>
import functools

import jax
import jax.numpy as jnp
import numpy as np
from jax.experimental import pallas as pl
from jax.experimental.pallas import tpu as pltpu

_SMOOTH = 1e-05
# Combined score+label bytes per (single) buffer; double-buffered this is
# ~16 MiB, comfortably inside v7x's 64 MiB VMEM and raised explicitly past the
# v5e/v6e scoped defaults via vmem_limit_bytes.
_BLOCK_BUDGET_BYTES = 8 * 1024 * 1024
_NATIVE_LABEL_DTYPES = (jnp.int8, jnp.uint8, jnp.int16, jnp.int32)


def _cdiv(a, b):
    return -(-a // b)


def _round_up(a, b):
    return _cdiv(a, b) * b


def _sublane_gran(itemsize):
    # Minimum second-minor tile multiple per element width (f32:8, bf16:16, i8:32).
    return {4: 8, 2: 16, 1: 32}.get(itemsize, 8)


def _pick_tile_rows(r, per_row_bytes, gran, budget_bytes, n_outer_parallel):
    """Chunk height TR: big (budget-bound), granularity-aligned, never whole-image
    fallback; ensures >=2 blocks on the non-class parallel axes when possible."""
    tr = max(budget_bytes // per_row_bytes, 1)
    if tr >= r:
        tr = r                                   # full extent is always legal
    else:
        tr = max((tr // gran) * gran, gran)
        if tr >= r:
            tr = r
    # Megacore balance (v7x has 2 TCs): want >=2 blocks on (N, chunk) axes.
    if n_outer_parallel * _cdiv(r, tr) < 2 and r > gran:
        half = _round_up(_cdiv(r, 2), gran)
        if half < r:
            tr = half
    return tr


def _dice_partial_kernel(x_ref, t_ref, out_ref, *, rows_total, tile_rows,
                         mask_rows):
    # x_ref:   (1, 1, TR, 128) scores for (image n, class c, chunk r)
    # t_ref:   (1, TR, 128)    labels for (image n, chunk r); shared across c
    # out_ref: (1, 3, 128)     lane-wise partials:
    #          row0 sum(score*onehot), row1 sum(score^2), row2 sum(onehot)
    c = pl.program_id(2)
    score = x_ref[0, 0].astype(jnp.float32)              # (TR, 128)
    labels = t_ref[0]                                    # (TR, 128) int
    cls_mask = labels == c                               # widen/compare in-kernel

    if mask_rows:                                        # ragged row tail
        rows_left = rows_total - pl.program_id(1) * tile_rows
        row_ids = jax.lax.broadcasted_iota(jnp.int32, score.shape, 0)
        valid = row_ids < rows_left
        cls_mask = jnp.logical_and(cls_mask, valid)
        score = jnp.where(valid, score, 0.0)

    inter = jnp.sum(jnp.where(cls_mask, score, 0.0), axis=0, keepdims=True)
    zsq = jnp.sum(score * score, axis=0, keepdims=True)
    cnt = jnp.sum(cls_mask, axis=0, keepdims=True).astype(jnp.float32)

    out_ref[0, 0:1, :] = inter
    out_ref[0, 1:2, :] = zsq
    out_ref[0, 2:3, :] = cnt


def _dice_softmax_kernel(x_ref, t_ref, out_ref, *, n_classes, rows_total,
                         tile_rows, mask_rows, mask_lanes):
    # Fused softmax path: x_ref (1, C, TR, 128) holds ALL classes of this pixel
    # chunk, so softmax + every per-class partial is one HBM pass.
    x = x_ref[0].astype(jnp.float32)                     # (C, TR, 128)
    labels = t_ref[0]                                    # (TR, 128)

    m = jnp.max(x, axis=0, keepdims=True)
    e = jnp.exp(x - m)
    p = e / jnp.sum(e, axis=0, keepdims=True)            # softmax over classes

    valid = None
    if mask_rows:                                        # ragged row tail
        rows_left = rows_total - pl.program_id(1) * tile_rows
        row_ids = jax.lax.broadcasted_iota(jnp.int32, labels.shape, 0)
        valid = row_ids < rows_left
    if mask_lanes:                                       # padded lane tail (labels == -1)
        lane_ok = labels >= 0
        valid = lane_ok if valid is None else jnp.logical_and(valid, lane_ok)
    if valid is not None:
        p = jnp.where(valid[None], p, 0.0)

    for i in range(n_classes):                           # static unroll over C
        s = p[i]                                         # (TR, 128)
        cls = labels == i
        if valid is not None:
            cls = jnp.logical_and(cls, valid)
        out_ref[0, i, 0:1, :] = jnp.sum(jnp.where(cls, s, 0.0), axis=0,
                                        keepdims=True)
        out_ref[0, i, 1:2, :] = jnp.sum(s * s, axis=0, keepdims=True)
        out_ref[0, i, 2:3, :] = jnp.sum(cls, axis=0,
                                        keepdims=True).astype(jnp.float32)


@functools.partial(jax.jit, static_argnames=("n_classes", "softmax"))
def dice_loss(inputs, target, n_classes, weight=None, softmax=False):
    """Pallas implementation of DiceLoss.forward.

    inputs: (N, C, H, W) scores (any float dtype); target: (N, H, W) class ids.
    Returns scalar float32 loss.
    """
    N, C, H, W = inputs.shape
    assert C == n_classes
    L = H * W

    x = inputs.reshape(N, C, L)                          # free reshape
    if L % 128 != 0:
        # Rare ragged lane tail: zero-pad scores / -1-pad labels.
        # TODO(synk): replace with an in-kernel lane-tail mask to stay zero-copy.
        pad = (-L) % 128
        x = jnp.pad(x, ((0, 0), (0, 0), (0, pad)))
        t = jnp.pad(target.reshape(N, L).astype(jnp.int32), ((0, 0), (0, pad)),
                    constant_values=-1)
        L += pad
        mask_lanes = True
    else:
        t = target.reshape(N, L)
        if not any(t.dtype == d for d in _NATIVE_LABEL_DTYPES):
            t = t.astype(jnp.int32)                      # only widen if unsupported
        mask_lanes = False

    R = L // 128
    x = x.reshape(N, C, R, 128)                          # free reshape
    t = t.reshape(N, R, 128)

    score_isz = jnp.dtype(x.dtype).itemsize
    label_isz = jnp.dtype(t.dtype).itemsize
    gran = max(_sublane_gran(score_isz), _sublane_gran(label_isz))

    if softmax:
        per_row = 128 * (C * score_isz + label_isz)
    else:
        per_row = 128 * (score_isz + label_isz)
    TR = _pick_tile_rows(R, per_row, gran, _BLOCK_BUDGET_BYTES, N)
    n_chunks = _cdiv(R, TR)
    mask_rows = (R % TR) != 0

    out_blk_bytes = (C if softmax else 1) * 3 * 128 * 4
    score_blk_bytes = (C if softmax else 1) * TR * 128 * score_isz
    label_blk_bytes = TR * 128 * label_isz
    vmem_limit = int(max(
        2 * (score_blk_bytes + label_blk_bytes + out_blk_bytes) + (4 << 20),
        32 << 20))

    if not softmax:
        n_blocks = N * n_chunks * C
        cost = pl.CostEstimate(
            flops=6 * N * C * L,
            transcendentals=0,
            bytes_accessed=N * C * L * score_isz + N * L * label_isz
            + n_blocks * 3 * 128 * 4)
        parts = pl.pallas_call(
            functools.partial(_dice_partial_kernel, rows_total=R, tile_rows=TR,
                              mask_rows=mask_rows),
            out_shape=jax.ShapeDtypeStruct((n_blocks, 3, 128), jnp.float32),
            grid=(N, n_chunks, C),
            in_specs=[
                # per-(image, class, chunk) score tile, straight from NCHW layout
                pl.BlockSpec((1, 1, TR, 128), lambda n, r, c: (n, c, r, 0)),
                # labels tile: index independent of c -> resident across classes
                pl.BlockSpec((1, TR, 128), lambda n, r, c: (n, r, 0)),
            ],
            out_specs=pl.BlockSpec(
                (1, 3, 128),
                lambda n, r, c: ((n * n_chunks + r) * C + c, 0, 0)),
            compiler_params=pltpu.CompilerParams(
                dimension_semantics=("parallel", "parallel", "parallel"),
                vmem_limit_bytes=vmem_limit),
            cost_estimate=cost,
        )(x, t)
        sums = parts.reshape(N * n_chunks, C, 3, 128).sum(axis=(0, 3))   # (C, 3)
    else:
        n_blocks = N * n_chunks
        cost = pl.CostEstimate(
            flops=10 * N * C * L,
            transcendentals=N * C * L,
            bytes_accessed=N * C * L * score_isz + N * L * label_isz
            + n_blocks * C * 3 * 128 * 4)
        parts = pl.pallas_call(
            functools.partial(_dice_softmax_kernel, n_classes=C, rows_total=R,
                              tile_rows=TR, mask_rows=mask_rows,
                              mask_lanes=mask_lanes),
            out_shape=jax.ShapeDtypeStruct((n_blocks, C, 3, 128), jnp.float32),
            grid=(N, n_chunks),
            in_specs=[
                # class-major block: all C scores for this pixel chunk
                pl.BlockSpec((1, C, TR, 128), lambda n, r: (n, 0, r, 0)),
                pl.BlockSpec((1, TR, 128), lambda n, r: (n, r, 0)),
            ],
            out_specs=pl.BlockSpec(
                (1, C, 3, 128), lambda n, r: (n * n_chunks + r, 0, 0, 0)),
            compiler_params=pltpu.CompilerParams(
                dimension_semantics=("parallel", "parallel"),
                vmem_limit_bytes=vmem_limit),
            cost_estimate=cost,
        )(x, t)
        sums = parts.sum(axis=(0, 3))                                     # (C, 3)

    # Tiny O(C) epilogue in plain JAX: smooth + weighted mean.
    intersect, z_sum, y_sum = sums[:, 0], sums[:, 1], sums[:, 2]
    dice = 1.0 - (2.0 * intersect + _SMOOTH) / (z_sum + y_sum + _SMOOTH)

    if weight is None:
        w = jnp.ones((n_classes,), jnp.float32)
    else:
        w = jnp.asarray(weight, jnp.float32)
    loss = jnp.sum(dice * w)
    wsum = jnp.sum(w)
    return jnp.where(wsum != 0, loss / jnp.where(wsum != 0, wsum, 1.0), loss)


def _reference_dice_loss(inputs, target, n_classes, weight=None, softmax=False):
    """Pure-JAX reference mirroring the PyTorch module."""
    if softmax:
        inputs = jax.nn.softmax(inputs, axis=1)
    if weight is None:
        weight = [1.0] * n_classes
    smooth = 1e-05
    loss = 0.0
    for i in range(n_classes):
        score = inputs[:, i].astype(jnp.float32)
        tgt = (target == i).astype(jnp.float32)
        intersect = jnp.sum(score * tgt)
        y_sum = jnp.sum(tgt * tgt)
        z_sum = jnp.sum(score * score)
        dice = 1.0 - (2 * intersect + smooth) / (z_sum + y_sum + smooth)
        loss = loss + dice * weight[i]
    s = sum(weight)
    return loss / s if s != 0 else loss


if __name__ == "__main__":
    key = jax.random.PRNGKey(0)
    k1, k2 = jax.random.split(key)

    N, C, H, W = 2, 4, 16, 16
    logits = jax.random.normal(k1, (N, C, H, W), dtype=jnp.float32)
    probs = jax.nn.softmax(logits, axis=1)        # probability-like predictions
    target = jax.random.randint(k2, (N, H, W), 0, C, dtype=jnp.int32)

    # unweighted, softmax=False
    loss = jax.block_until_ready(dice_loss(probs, target, n_classes=C))
    ref = _reference_dice_loss(probs, target, n_classes=C)
    np.testing.assert_allclose(np.asarray(loss), np.asarray(ref),
                               rtol=1e-5, atol=1e-6)

    # weighted (weights are a runtime array -> same compiled kernel)
    w = jnp.asarray([0.1, 0.2, 0.3, 0.4], jnp.float32)
    loss_w = jax.block_until_ready(dice_loss(probs, target, n_classes=C, weight=w))
    ref_w = _reference_dice_loss(probs, target, n_classes=C,
                                 weight=[0.1, 0.2, 0.3, 0.4])
    np.testing.assert_allclose(np.asarray(loss_w), np.asarray(ref_w),
                               rtol=1e-5, atol=1e-6)

    # fused softmax path (logits in, softmax computed inside the kernel)
    loss_s = jax.block_until_ready(dice_loss(logits, target, n_classes=C,
                                             softmax=True))
    ref_s = _reference_dice_loss(logits, target, n_classes=C, softmax=True)
    np.testing.assert_allclose(np.asarray(loss_s), np.asarray(ref_s),
                               rtol=1e-5, atol=1e-5)

    print("KERNEL_OK")
</pallas_src>

<mosaic_0001>
module attributes {stable_mosaic.version = 11 : i64} {
  func.func @_dice_partial_kernel(%arg0: i32, %arg1: i32, %arg2: i32, %arg3: memref<1x1x2x128xf32, #tpu.memory_space<vmem>>, %arg4: memref<1x2x128xi32, #tpu.memory_space<vmem>>, %arg5: memref<1x3x128xf32, #tpu.memory_space<vmem>>) attributes {dimension_semantics = [#tpu.dimension_semantics<parallel>, #tpu.dimension_semantics<parallel>, #tpu.dimension_semantics<parallel>], iteration_bounds = array<i64: 2, 1, 4>, scalar_prefetch = 0 : i64, scratch_operands = 0 : i64, tpu.core_type = #tpu.core_type<tc>, window_params = [{transform_indices = @transform_0, window_bounds = array<i64: 1, 1, 2, 128>}, {transform_indices = @transform_1, window_bounds = array<i64: 1, 2, 128>}, {transform_indices = @transform_2, window_bounds = array<i64: 1, 3, 128>}]} {
    %c0 = arith.constant 0 : index
    %c0_0 = arith.constant 0 : index
    %c0_1 = arith.constant 0 : index
    %c0_2 = arith.constant 0 : index
    %0 = vector.load %arg3[%c0, %c0_0, %c0_1, %c0_2] : memref<1x1x2x128xf32, #tpu.memory_space<vmem>>, vector<1x1x2x128xf32>
    %1 = vector.shape_cast %0 : vector<1x1x2x128xf32> to vector<2x128xf32>
    %c0_3 = arith.constant 0 : index
    %c0_4 = arith.constant 0 : index
    %c0_5 = arith.constant 0 : index
    %2 = vector.load %arg4[%c0_3, %c0_4, %c0_5] : memref<1x2x128xi32, #tpu.memory_space<vmem>>, vector<1x2x128xi32>
    %3 = vector.shape_cast %2 : vector<1x2x128xi32> to vector<2x128xi32>
    %4 = vector.broadcast %arg2 : i32 to vector<2x128xi32>
    %5 = arith.cmpi eq, %3, %4 : vector<2x128xi32>
    %cst = arith.constant 0.000000e+00 : f32
    %6 = vector.broadcast %cst : f32 to vector<2x128xf32>
    %7 = arith.select %5, %1, %6 : vector<2x128xi1>, vector<2x128xf32>
    %cst_6 = arith.constant dense<0.000000e+00> : vector<128xf32>
    %8 = vector.multi_reduction <add>, %7, %cst_6 [0] : vector<2x128xf32> to vector<128xf32>
    %9 = vector.shape_cast %8 : vector<128xf32> to vector<1x128xf32>
    %10 = arith.mulf %1, %1 : vector<2x128xf32>
    %cst_7 = arith.constant dense<0.000000e+00> : vector<128xf32>
    %11 = vector.multi_reduction <add>, %10, %cst_7 [0] : vector<2x128xf32> to vector<128xf32>
    %12 = vector.shape_cast %11 : vector<128xf32> to vector<1x128xf32>
    %13 = arith.extui %5 : vector<2x128xi1> to vector<2x128xi32>
    %cst_8 = arith.constant dense<0> : vector<128xi32>
    %14 = vector.multi_reduction <add>, %13, %cst_8 [0] : vector<2x128xi32> to vector<128xi32>
    %15 = vector.shape_cast %14 : vector<128xi32> to vector<1x128xi32>
    %16 = arith.sitofp %15 : vector<1x128xi32> to vector<1x128xf32>
    %c0_9 = arith.constant 0 : index
    %c0_10 = arith.constant 0 : index
    %c0_11 = arith.constant 0 : index
    %17 = vector.load %arg5[%c0_9, %c0_10, %c0_11] : memref<1x3x128xf32, #tpu.memory_space<vmem>>, vector<1x1x128xf32>
    %18 = vector.shape_cast %17 : vector<1x1x128xf32> to vector<1x128xf32>
    %19 = vector.shape_cast %9 : vector<1x128xf32> to vector<1x1x128xf32>
    tpu.vector_store %arg5[%c0_9, %c0_10, %c0_11], %19 {strides = array<i32>} : memref<1x3x128xf32, #tpu.memory_space<vmem>>, vector<1x1x128xf32>,
    %c0_12 = arith.constant 0 : index
    %c1 = arith.constant 1 : index
    %c0_13 = arith.constant 0 : index
    %20 = vector.load %arg5[%c0_12, %c1, %c0_13] : memref<1x3x128xf32, #tpu.memory_space<vmem>>, vector<1x1x128xf32>
    %21 = vector.shape_cast %20 : vector<1x1x128xf32> to vector<1x128xf32>
    %22 = vector.shape_cast %12 : vector<1x128xf32> to vector<1x1x128xf32>
    tpu.vector_store %arg5[%c0_12, %c1, %c0_13], %22 {strides = array<i32>} : memref<1x3x128xf32, #tpu.memory_space<vmem>>, vector<1x1x128xf32>,
    %c0_14 = arith.constant 0 : index
    %c2 = arith.constant 2 : index
    %c0_15 = arith.constant 0 : index
    %23 = vector.load %arg5[%c0_14, %c2, %c0_15] : memref<1x3x128xf32, #tpu.memory_space<vmem>>, vector<1x1x128xf32>
    %24 = vector.shape_cast %23 : vector<1x1x128xf32> to vector<1x128xf32>
    %25 = vector.shape_cast %16 : vector<1x128xf32> to vector<1x1x128xf32>
    tpu.vector_store %arg5[%c0_14, %c2, %c0_15], %25 {strides = array<i32>} : memref<1x3x128xf32, #tpu.memory_space<vmem>>, vector<1x1x128xf32>,
    return
  }
  func.func @transform_0(%arg0: i32, %arg1: i32, %arg2: i32) -> (i32, i32, i32, i32) {
    %c0_i32 = arith.constant 0 : i32
    %c0_i32_0 = arith.constant 0 : i32
    return %arg0, %arg2, %arg1, %c0_i32 : i32, i32, i32, i32
  }
  func.func @transform_1(%arg0: i32, %arg1: i32, %arg2: i32) -> (i32, i32, i32) {
    %c0_i32 = arith.constant 0 : i32
    %c0_i32_0 = arith.constant 0 : i32
    return %arg0, %arg1, %c0_i32 : i32, i32, i32
  }
  func.func @transform_2(%arg0: i32, %arg1: i32, %arg2: i32) -> (i32, i32, i32) {
    %c1_i32 = arith.constant 1 : i32
    %0 = arith.muli %arg0, %c1_i32 : i32
    %1 = arith.addi %0, %arg1 : i32
    %c4_i32 = arith.constant 4 : i32
    %2 = arith.muli %1, %c4_i32 : i32
    %3 = arith.addi %2, %arg2 : i32
    %c0_i32 = arith.constant 0 : i32
    %c0_i32_0 = arith.constant 0 : i32
    %c0_i32_1 = arith.constant 0 : i32
    return %3, %c0_i32, %c0_i32_0 : i32, i32, i32
  }
}

</mosaic_0001>

<bundles_post_ra>
// kernel: dice_loss.1
= control target key start
LH: loop header
LB: loop body
LE: loop exit
PB: predicated region body
PF: predicated region fallthrough
CT: control target
= control target key end

     0   :  { %s471_s9 = smov 0   ;;  %s473_s10 = smov 0   ;;  %s531_s0 = inlined_call_operand.vmem [shape: f32[2,4,2,128], index: 0, kind: input, shape index: {}]   ;;  %s532_s1 = inlined_call_operand.vmem [shape: s32[2,2,128], index: 1, kind: input, shape index: {}]   ;;  %s533_s2 = inlined_call_operand.vmem [shape: f32[8,3,128], index: 2, kind: output, shape index: {}]  }
   0x1   :  { %s475_s11 = smov 0   ;;  %s477_s12 = smov 0  }
   0x2   :  { %s479_s13 = smov 0  }
   0x3 LB: > { %s24_s14 = sadd.s32 1, %s445_s11  ;;  %s31_s15 = sadd.s32 1, %s449_s12  ;;  %s453_s13 = sphi %s479_s13, %s12_s13   ;;  %s449_s12 = sphi %s477_s12, %s537_s12   ;;  %s445_s11 = sphi %s475_s11, %s536_s11   ;;  %s441_s10 = sphi %s473_s10, %s535_s10   ;;  %s437_s9 = sphi %s471_s9, %s534_s9  }
   0x4   : > { %p25_p0 = scmp.ge.s32.totalorder %s24_s14, 4  ;;  %p366_p1 = scmp.ge.s32.totalorder %s453_s13, 1 }
   0x5   : > { %p161_p2 = scmp.lt.s32.totalorder %s453_s13, 9 }
   0x6   : > { %s539_s14 = smov (%p25_p0, %s24_s14), 0  ;;  %s541_s15 = smov (!%p25_p0, %s31_s15), %s449_s12 }
   0x7   : > { %p162_p3 = pnand %p366_p1, %p161_p2  ;;  %p33_p4 = scmp.ge.s32.totalorder %s541_s15, 2 }
   0x8   : > { %p198_p5 = scmp.lt.s32.totalorder (!%p162_p3), %s441_s10, 1  ;;  %p200_p6 = scmp.lt.s32.totalorder (!%p162_p3), %s437_s9, 3  ;;  %v228_v0 = vstv (!%p162_p3), %s437_s9  ;;  %vm231_vm0 = vcmask (!%p162_p3), 1041408   ;;  %v455_v3 = vmov (!%p162_p3), 0  }
   0x9   : > { %s543_s15 = smov (%p33_p4, %s541_s15), 0  ;;  %165 = sbr.rel (%p162_p3) target bundleno = 39 (0x27), region = 28 }
   0xa   : > { %s370_s16 = sshll.u32 (!%p162_p3), %s441_s10, 2 }
   0xb   : > { %s218_s25 = sadd.s32 (!%p162_p3), %s437_s9, %s370_s16 }
   0xc   : > { %p219_p7 = scmp.lt.s32.totalorder (!%p162_p3), %s218_s25, 7 }
  0x10   : > { %s545_s10 = smov (!%p198_p5, %s441_s10), 1  ;;  %s547_s25 = smov (!%p219_p7, %s218_s25), 7 }
  0x11   : > { %s201_s17 = scalar_select %p200_p6, %s437_s9, 3 }
  0x12   : > { %s367_s18 = sshll.u32 %s545_s10, 2  ;;  %s369_s19 = sshll.u32 %s545_s10, 1 }
  0x13   : > { %s206_s20 = sadd.s32 %s367_s18, %s201_s17  ;;  %s215_s23 = scalar_lea.vmem %s532_s1, %s369_s19 }
  0x14   : > { %s368_s24 = sshll.u32 %s206_s20, 1  ;;  %v227_v1 = vld [vmem:[%s215_s23] sm:$0x3]  ;;  %s371_s29 = sshll.u32 %s547_s25, 2 }
  0x15   : > { %s208_s28 = scalar_lea.vmem %s531_s0, %s368_s24  ;;  %vm229_vm1 = vcmp.eq.s32.totalorder %v227_v1, %v228_v0  ;;  %s222_s4 = scalar_lea.vmem %s533_s2, %s371_s29 }
  0x16   : > { %v226_v2 = vld [vmem:[%s208_s28] sm:$0x3]  ;;  %v247_v4 = vsel %vm229_vm1, 1, %v455_v3 }
  0x17   : > { %v230_v5 = vsel %vm229_vm1, %v226_v2, 0.0  ;;  %v239_v6 = vmul.f32 %v226_v2, %v226_v2  ;;  %v248_v7 = vsel %vm231_vm0, %v247_v4, 0 }
  0x18   : > { %v232_v8 = vsel %vm231_vm0, %v230_v5, 0.0  ;;  %v249_v9 = vrot.slane %v248_v7, 4 }
  0x19   : > { %v233_v10 = vrot.slane %v232_v8, 4  ;;  %v240_v11 = vsel %vm231_vm0, %v239_v6, 0.0 }
  0x1a   : > { %v241_v12 = vrot.slane %v240_v11, 4  ;;  %v250_v13 = vadd.s32 %v249_v9, %v248_v7 }
  0x1b   : > { %v234_v14 = vadd.f32 %v233_v10, %v232_v8 }
  0x1c   : > { %v242_v15 = vadd.f32 %v241_v12, %v240_v11  ;;  %v251_v16 = vrot.slane %v250_v13, 2 }
  0x1d   : > { %v235_v17 = vrot.slane %v234_v14, 2 }
  0x1e   : > { %v243_v18 = vrot.slane %v242_v15, 2  ;;  %v252_v19 = vadd.s32 %v251_v16, %v250_v13 }
  0x1f   : > { %v236_v20 = vadd.f32 %v235_v17, %v234_v14 }
  0x20   : > { %v244_v21 = vadd.f32 %v243_v18, %v242_v15  ;;  %v253_v22 = vrot.slane %v252_v19, 1 }
  0x21   : > { %v237_v23 = vrot.slane %v236_v20, 1 }
  0x22   : > { %v245_v24 = vrot.slane %v244_v21, 1  ;;  %v254_v25 = vadd.s32 %v253_v22, %v252_v19 }
  0x23   : > { %v238_v26 = vadd.f32 %v237_v23, %v236_v20 }
  0x24   : > { %v246_v27 = vadd.f32 %v245_v24, %v244_v21  ;;  %v255_v28 = vcvt.s32.f32 %v254_v25 }
  0x25   : > { %256 = vst [vmem:[%s222_s4] sm:$0x1] %v238_v26 }
  0x26   : > { %257 = vst [vmem:[%s222_s4 + $0x1] sm:$0x1] %v246_v27  ;;  %258 = vst [vmem:[%s222_s4 + $0x2] sm:$0x1] %v255_v28 }
  0x27 PF: > { %s12_s13 = sadd.s32 1, %s453_s13   ;;  %s534_s9 = smov %s445_s11 }
  0x28   : > { %p9_p8 = scmp.ge.s32.totalorder %s12_s13, 10   ;;  %s535_s10 = smov %s449_s12 }
  0x29   : > { %s536_s11 = smov %s539_s14  ;;  %s537_s12 = smov %s543_s15 }
  0x2a   :  { %11 = sbr.rel (!%p9_p8) target bundleno = 3 (0x3), region = 61 }

</bundles_post_ra>
